<compile_context>
chip_gen: v7x
topology: tpu7x:2x2x1
jax: 0.10.0
libtpu: 0.0.40
codegen_flags: <defaults>
</compile_context>

<pallas_src>
import functools

import jax
import jax.numpy as jnp
from jax.experimental import pallas as pl
from jax.experimental.pallas import tpu as pltpu


_LANE = 128


def _round_up(n, m):
    return ((n + m - 1) // m) * m


# ---------------------------------------------------------------------------
# One-time parameter preparation (hoisted out of the forward hot path):
#   - fold eval-mode BatchNorm into the preceding Linear
#   - cast weights to bf16 for the MXU (biases stay f32, added to f32 acc)
#   - pad the tiny output head (T=2) to one full 128-lane vreg
# ---------------------------------------------------------------------------
def prepare_params(params, compute_dtype=jnp.bfloat16):
    (w1, b1, g1, be1, rm1, rv1,
     w2, b2, g2, be2, rm2, rv2,
     w3, b3) = params
    eps = jnp.float32(1e-5)

    # BN(y) = y * s + t  with  s = gamma / sqrt(rv + eps),  t = beta - rm * s
    s1 = g1 * jax.lax.rsqrt(rv1 + eps)
    t1 = be1 - rm1 * s1
    w1f = (w1 * s1[None, :]).astype(compute_dtype)
    b1f = (b1 * s1 + t1).astype(jnp.float32)[None, :]

    s2 = g2 * jax.lax.rsqrt(rv2 + eps)
    t2 = be2 - rm2 * s2
    w2f = (w2 * s2[None, :]).astype(compute_dtype)
    b2f = (b2 * s2 + t2).astype(jnp.float32)[None, :]

    H2, T = w3.shape
    T_pad = _round_up(max(T, _LANE), _LANE)
    w3f = jnp.zeros((H2, T_pad), compute_dtype).at[:, :T].set(w3.astype(compute_dtype))
    b3f = jnp.zeros((1, T_pad), jnp.float32).at[:, :T].set(
        b3.astype(jnp.float32)[None, :])

    return (w1f, b1f, w2f, b2f, w3f, b3f)


# ---------------------------------------------------------------------------
# Pallas kernel: fused 3-layer MLP (BN already folded into weights / biases).
# The M dimension of the tile is processed in sub-tiles so the VPU epilogue
# (bias + LeakyReLU + cast) of one sub-tile overlaps the next one's matmuls.
# ---------------------------------------------------------------------------
def _mlp_kernel(x_ref,
                w1_ref, b1_ref,
                w2_ref, b2_ref,
                w3_ref, b3_ref,
                o_ref, *, sub_m):
    neg = jnp.float32(0.01)
    cdt = w1_ref.dtype                         # bf16 compute dtype
    n_sub = x_ref.shape[0] // sub_m            # static

    for j in range(n_sub):                     # static unrolled loop
        rows = pl.ds(j * sub_m, sub_m)

        # f32 -> bf16 cast after the VMEM load (kernel is MXU-bound; free).
        x = x_ref[rows, :].astype(cdt)

        # ---- Linear 1 (BN1 folded) + LeakyReLU -----------------------------
        h = jnp.dot(x, w1_ref[...], preferred_element_type=jnp.float32)
        h = h + b1_ref[...]
        h = jnp.maximum(h, neg * h)
        # Dropout(p=0.5): identity in eval mode.
        # TODO(synk): train-mode stochastic dropout not implemented (eval semantics).

        # ---- Linear 2 (BN2 folded) + LeakyReLU -----------------------------
        h = jnp.dot(h.astype(cdt), w2_ref[...], preferred_element_type=jnp.float32)
        h = h + b2_ref[...]
        h = jnp.maximum(h, neg * h)

        # ---- Linear 3 (output head, lane-dense 128-wide) -------------------
        out = jnp.dot(h.astype(cdt), w3_ref[...], preferred_element_type=jnp.float32)
        out = out + b3_ref[...]

        o_ref[rows, :] = out.astype(o_ref.dtype)


# ---------------------------------------------------------------------------
# Forward wrapper: only batch tiling / minimal batch padding happens per call.
# ---------------------------------------------------------------------------
def resnet_features_lc_forward(x, folded_params, *, target_dim, batch_tile=512):
    """x: [B, in_features] f32 -> [B, target_dim] f32 (eval-mode forward)."""
    w1f, b1f, w2f, b2f, w3f, b3f = folded_params

    B, F_in = x.shape
    H1 = w1f.shape[1]
    H2 = w2f.shape[1]
    T_pad = w3f.shape[1]

    # Batch tiling: multiple of 8 sublanes; >=2 grid steps whenever B > 8 so
    # ("parallel",) can shard across both v7x TensorCores.
    tile_m = min(batch_tile, max(8, _round_up(-(-B // 2), 8)))
    B_pad = _round_up(B, tile_m)
    x_in = x
    if B_pad != B:
        x_in = jnp.pad(x, ((0, B_pad - B), (0, 0)))
    grid = (B_pad // tile_m,)

    # In-kernel M sub-tiling for MXU/VPU overlap.
    sub_m = 128 if tile_m % 128 == 0 else tile_m

    flops = 2 * B_pad * (F_in * H1 + H1 * H2 + H2 * T_pad)
    bytes_accessed = (
        x_in.size * x_in.dtype.itemsize
        + sum(a.size * a.dtype.itemsize for a in (w1f, b1f, w2f, b2f, w3f, b3f))
        + B_pad * T_pad * 4)
    cost = pl.CostEstimate(flops=flops, transcendentals=0,
                           bytes_accessed=bytes_accessed)

    kernel = functools.partial(_mlp_kernel, sub_m=sub_m)

    def build(weight_mode):
        def wspec(shape):
            # Grid-invariant weight/bias block (never re-DMA'd after step 0).
            if weight_mode is None:
                return pl.BlockSpec(shape, lambda i: (0, 0))
            return pl.BlockSpec(shape, lambda i: (0, 0), pipeline_mode=weight_mode)

        return pl.pallas_call(
            kernel,
            out_shape=jax.ShapeDtypeStruct((B_pad, T_pad), jnp.float32),
            grid_spec=pltpu.PrefetchScalarGridSpec(
                num_scalar_prefetch=0,
                grid=grid,
                in_specs=[
                    pl.BlockSpec((tile_m, F_in), lambda i: (i, 0)),   # x tile (f32)
                    wspec((F_in, H1)), wspec((1, H1)),
                    wspec((H1, H2)),  wspec((1, H2)),
                    wspec((H2, T_pad)), wspec((1, T_pad)),
                ],
                out_specs=pl.BlockSpec((tile_m, T_pad), lambda i: (i, 0)),
            ),
            compiler_params=pltpu.CompilerParams(
                dimension_semantics=("parallel",),
                # bf16 weights + f32 x tiles: ~25-30 MiB at real sizes; 48 MiB
                # gives headroom on v5e/v6e and stays inside v7x's 64 MiB VMEM.
                vmem_limit_bytes=48 * 1024 * 1024,
            ),
            cost_estimate=cost,
        )

    args = (x_in, w1f, b1f, w2f, b2f, w3f, b3f)
    try:
        # Single-buffer the grid-invariant weights (saves VMEM, esp. on v7x).
        out = build(pl.Buffered(1))(*args)
    except Exception:
        # Fallback: default double-buffering if this JAX rejects Buffered(1).
        out = build(None)(*args)

    return out[:B, :target_dim]


# ---------------------------------------------------------------------------
# Deterministic parameters mirroring the module's __init__:
#   nn.Linear weights: xavier_normal_, biases: normal_
#   nn.BatchNorm1d: gamma=1, beta=0, running_mean=0, running_var=1, eps=1e-5
# ---------------------------------------------------------------------------
def make_params(key, in_features, intermediate_1, intermediate_2, target_dim):
    def xavier_normal(k, fan_in, fan_out):
        std = jnp.sqrt(2.0 / (fan_in + fan_out))
        # PyTorch weight is [out, in]; we store the transpose [in, out] for x @ W.
        return jax.random.normal(k, (fan_in, fan_out), jnp.float32) * std

    ks = jax.random.split(key, 6)
    w1 = xavier_normal(ks[0], in_features, intermediate_1)
    b1 = jax.random.normal(ks[1], (intermediate_1,), jnp.float32)
    w2 = xavier_normal(ks[2], intermediate_1, intermediate_2)
    b2 = jax.random.normal(ks[3], (intermediate_2,), jnp.float32)
    w3 = xavier_normal(ks[4], intermediate_2, target_dim)
    b3 = jax.random.normal(ks[5], (target_dim,), jnp.float32)

    g1 = jnp.ones((intermediate_1,), jnp.float32)
    be1 = jnp.zeros((intermediate_1,), jnp.float32)
    rm1 = jnp.zeros((intermediate_1,), jnp.float32)
    rv1 = jnp.ones((intermediate_1,), jnp.float32)

    g2 = jnp.ones((intermediate_2,), jnp.float32)
    be2 = jnp.zeros((intermediate_2,), jnp.float32)
    rm2 = jnp.zeros((intermediate_2,), jnp.float32)
    rv2 = jnp.ones((intermediate_2,), jnp.float32)

    return (w1, b1, g1, be1, rm1, rv1,
            w2, b2, g2, be2, rm2, rv2,
            w3, b3)


# ---------------------------------------------------------------------------
# Pure-JAX f32 reference (un-folded BN) for correctness checking.
# ---------------------------------------------------------------------------
def reference_forward(x, params):
    (w1, b1, g1, be1, rm1, rv1,
     w2, b2, g2, be2, rm2, rv2,
     w3, b3) = params
    eps = 1e-5
    h = x @ w1 + b1
    h = (h - rm1) / jnp.sqrt(rv1 + eps) * g1 + be1
    h = jnp.where(h >= 0, h, 0.01 * h)
    h = h @ w2 + b2
    h = (h - rm2) / jnp.sqrt(rv2 + eps) * g2 + be2
    h = jnp.where(h >= 0, h, 0.01 * h)
    return h @ w3 + b3


if __name__ == "__main__":
    # Small shapes consistent with the module's MLP structure
    # (real module: in=2048, i1=i2=1024, target=2).
    # B=20 exercises both the multi-tile grid and the batch-padding path.
    B, IN_FEATURES, I1, I2, TARGET = 20, 256, 128, 128, 2

    key = jax.random.PRNGKey(0)
    k_x, k_p = jax.random.split(key)
    x = jax.random.normal(k_x, (B, IN_FEATURES), jnp.float32)
    params = make_params(k_p, IN_FEATURES, I1, I2, TARGET)

    # One-time prep (BN fold, bf16 cast, head padding) hoisted out of the
    # per-call forward; reuse `folded` for every subsequent forward call.
    folded = prepare_params(params)
    folded = jax.block_until_ready(folded)

    out = resnet_features_lc_forward(x, folded, target_dim=TARGET)
    out = jax.block_until_ready(out)

    ref = reference_forward(x, params)
    assert out.shape == (B, TARGET), out.shape
    # bf16 compute with f32 accumulation vs. pure-f32 reference: loose tolerance.
    max_err = float(jnp.max(jnp.abs(out - ref)))
    assert max_err < 1e-1, f"mismatch vs reference, max_err={max_err}"

    print("KERNEL_OK")
</pallas_src>

<mosaic_0001>
module attributes {stable_mosaic.version = 11 : i64} {
  func.func @_mlp_kernel(%arg0: i32, %arg1: memref<16x256xf32, #tpu.memory_space<vmem>>, %arg2: memref<256x128xbf16, #tpu.memory_space<vmem>>, %arg3: memref<1x128xf32, #tpu.memory_space<vmem>>, %arg4: memref<128x128xbf16, #tpu.memory_space<vmem>>, %arg5: memref<1x128xf32, #tpu.memory_space<vmem>>, %arg6: memref<128x128xbf16, #tpu.memory_space<vmem>>, %arg7: memref<1x128xf32, #tpu.memory_space<vmem>>, %arg8: memref<16x128xf32, #tpu.memory_space<vmem>>) attributes {dimension_semantics = [#tpu.dimension_semantics<parallel>], iteration_bounds = array<i64: 2>, scalar_prefetch = 0 : i64, scratch_operands = 0 : i64, tpu.core_type = #tpu.core_type<tc>, window_params = [{transform_indices = @transform_0, window_bounds = array<i64: 16, 256>}, {pipeline_mode = #tpu.pipeline_mode<synchronous>, transform_indices = @transform_1, window_bounds = array<i64: 256, 128>}, {pipeline_mode = #tpu.pipeline_mode<synchronous>, transform_indices = @transform_2, window_bounds = array<i64: 1, 128>}, {pipeline_mode = #tpu.pipeline_mode<synchronous>, transform_indices = @transform_3, window_bounds = array<i64: 128, 128>}, {pipeline_mode = #tpu.pipeline_mode<synchronous>, transform_indices = @transform_4, window_bounds = array<i64: 1, 128>}, {pipeline_mode = #tpu.pipeline_mode<synchronous>, transform_indices = @transform_5, window_bounds = array<i64: 128, 128>}, {pipeline_mode = #tpu.pipeline_mode<synchronous>, transform_indices = @transform_6, window_bounds = array<i64: 1, 128>}, {transform_indices = @transform_7, window_bounds = array<i64: 16, 128>}]} {
    %c0 = arith.constant 0 : index
    %c0_0 = arith.constant 0 : index
    %0 = vector.load %arg1[%c0, %c0_0] : memref<16x256xf32, #tpu.memory_space<vmem>>, vector<16x256xf32>
    %1 = arith.truncf %0 : vector<16x256xf32> to vector<16x256xbf16>
    %c0_1 = arith.constant 0 : index
    %c0_2 = arith.constant 0 : index
    %2 = vector.load %arg2[%c0_1, %c0_2] : memref<256x128xbf16, #tpu.memory_space<vmem>>, vector<256x128xbf16>
    %cst = arith.constant dense<0.000000e+00> : vector<16x128xf32>
    %3 = tpu.matmul %1, %2, %cst {dimension_numbers = #tpu.dot_dimension_numbers<[1], [0], [0], [1], [0, 0, 1, 1], [], []>} : vector<16x256xbf16>, vector<256x128xbf16>, vector<16x128xf32> -> vector<16x128xf32>
    %c0_3 = arith.constant 0 : index
    %c0_4 = arith.constant 0 : index
    %4 = vector.load %arg3[%c0_3, %c0_4] : memref<1x128xf32, #tpu.memory_space<vmem>>, vector<1x128xf32>
    %5 = vector.broadcast %4 : vector<1x128xf32> to vector<16x128xf32>
    %6 = arith.addf %3, %5 : vector<16x128xf32>
    %cst_5 = arith.constant 0.00999999977 : f32
    %7 = vector.broadcast %cst_5 : f32 to vector<16x128xf32>
    %8 = arith.mulf %7, %6 : vector<16x128xf32>
    %9 = arith.maximumf %6, %8 : vector<16x128xf32>
    %10 = arith.truncf %9 : vector<16x128xf32> to vector<16x128xbf16>
    %c0_6 = arith.constant 0 : index
    %c0_7 = arith.constant 0 : index
    %11 = vector.load %arg4[%c0_6, %c0_7] : memref<128x128xbf16, #tpu.memory_space<vmem>>, vector<128x128xbf16>
    %cst_8 = arith.constant dense<0.000000e+00> : vector<16x128xf32>
    %12 = tpu.matmul %10, %11, %cst_8 {dimension_numbers = #tpu.dot_dimension_numbers<[1], [0], [0], [1], [0, 0, 1, 1], [], []>} : vector<16x128xbf16>, vector<128x128xbf16>, vector<16x128xf32> -> vector<16x128xf32>
    %c0_9 = arith.constant 0 : index
    %c0_10 = arith.constant 0 : index
    %13 = vector.load %arg5[%c0_9, %c0_10] : memref<1x128xf32, #tpu.memory_space<vmem>>, vector<1x128xf32>
    %14 = vector.broadcast %13 : vector<1x128xf32> to vector<16x128xf32>
    %15 = arith.addf %12, %14 : vector<16x128xf32>
    %cst_11 = arith.constant 0.00999999977 : f32
    %16 = vector.broadcast %cst_11 : f32 to vector<16x128xf32>
    %17 = arith.mulf %16, %15 : vector<16x128xf32>
    %18 = arith.maximumf %15, %17 : vector<16x128xf32>
    %19 = arith.truncf %18 : vector<16x128xf32> to vector<16x128xbf16>
    %c0_12 = arith.constant 0 : index
    %c0_13 = arith.constant 0 : index
    %20 = vector.load %arg6[%c0_12, %c0_13] : memref<128x128xbf16, #tpu.memory_space<vmem>>, vector<128x128xbf16>
    %cst_14 = arith.constant dense<0.000000e+00> : vector<16x128xf32>
    %21 = tpu.matmul %19, %20, %cst_14 {dimension_numbers = #tpu.dot_dimension_numbers<[1], [0], [0], [1], [0, 0, 1, 1], [], []>} : vector<16x128xbf16>, vector<128x128xbf16>, vector<16x128xf32> -> vector<16x128xf32>
    %c0_15 = arith.constant 0 : index
    %c0_16 = arith.constant 0 : index
    %22 = vector.load %arg7[%c0_15, %c0_16] : memref<1x128xf32, #tpu.memory_space<vmem>>, vector<1x128xf32>
    %23 = vector.broadcast %22 : vector<1x128xf32> to vector<16x128xf32>
    %24 = arith.addf %21, %23 : vector<16x128xf32>
    %c0_17 = arith.constant 0 : index
    %c0_18 = arith.constant 0 : index
    %25 = vector.load %arg8[%c0_17, %c0_18] : memref<16x128xf32, #tpu.memory_space<vmem>>, vector<16x128xf32>
    tpu.vector_store %arg8[%c0_17, %c0_18], %24 {strides = array<i32>} : memref<16x128xf32, #tpu.memory_space<vmem>>, vector<16x128xf32>,
    return
  }
  func.func @transform_0(%arg0: i32) -> (i32, i32) {
    %c0_i32 = arith.constant 0 : i32
    %c0_i32_0 = arith.constant 0 : i32
    return %arg0, %c0_i32 : i32, i32
  }
  func.func @transform_1(%arg0: i32) -> (i32, i32) {
    %c0_i32 = arith.constant 0 : i32
    %c0_i32_0 = arith.constant 0 : i32
    %c0_i32_1 = arith.constant 0 : i32
    return %c0_i32, %c0_i32_0 : i32, i32
  }
  func.func @transform_2(%arg0: i32) -> (i32, i32) {
    %c0_i32 = arith.constant 0 : i32
    %c0_i32_0 = arith.constant 0 : i32
    %c0_i32_1 = arith.constant 0 : i32
    return %c0_i32, %c0_i32_0 : i32, i32
  }
  func.func @transform_3(%arg0: i32) -> (i32, i32) {
    %c0_i32 = arith.constant 0 : i32
    %c0_i32_0 = arith.constant 0 : i32
    %c0_i32_1 = arith.constant 0 : i32
    return %c0_i32, %c0_i32_0 : i32, i32
  }
  func.func @transform_4(%arg0: i32) -> (i32, i32) {
    %c0_i32 = arith.constant 0 : i32
    %c0_i32_0 = arith.constant 0 : i32
    %c0_i32_1 = arith.constant 0 : i32
    return %c0_i32, %c0_i32_0 : i32, i32
  }
  func.func @transform_5(%arg0: i32) -> (i32, i32) {
    %c0_i32 = arith.constant 0 : i32
    %c0_i32_0 = arith.constant 0 : i32
    %c0_i32_1 = arith.constant 0 : i32
    return %c0_i32, %c0_i32_0 : i32, i32
  }
  func.func @transform_6(%arg0: i32) -> (i32, i32) {
    %c0_i32 = arith.constant 0 : i32
    %c0_i32_0 = arith.constant 0 : i32
    %c0_i32_1 = arith.constant 0 : i32
    return %c0_i32, %c0_i32_0 : i32, i32
  }
  func.func @transform_7(%arg0: i32) -> (i32, i32) {
    %c0_i32 = arith.constant 0 : i32
    %c0_i32_0 = arith.constant 0 : i32
    return %arg0, %c0_i32 : i32, i32
  }
}

module attributes {stable_mosaic.version = 11 : i64} {
  func.func @_mlp_kernel(%arg0: i32, %arg1: memref<16x256xf32, #tpu.memory_space<vmem>>, %arg2: memref<256x128xbf16, #tpu.memory_space<vmem>>, %arg3: memref<1x128xf32, #tpu.memory_space<vmem>>, %arg4: memref<128x128xbf16, #tpu.memory_space<vmem>>, %arg5: memref<1x128xf32, #tpu.memory_space<vmem>>, %arg6: memref<128x128xbf16, #tpu.memory_space<vmem>>, %arg7: memref<1x128xf32, #tpu.memory_space<vmem>>, %arg8: memref<16x128xf32, #tpu.memory_space<vmem>>) attributes {dimension_semantics = [#tpu.dimension_semantics<parallel>], iteration_bounds = array<i64: 2>, scalar_prefetch = 0 : i64, scratch_operands = 0 : i64, tpu.core_type = #tpu.core_type<tc>, window_params = [{transform_indices = @transform_0, window_bounds = array<i64: 16, 256>}, {pipeline_mode = #tpu.pipeline_mode<synchronous>, transform_indices = @transform_1, window_bounds = array<i64: 256, 128>}, {pipeline_mode = #tpu.pipeline_mode<synchronous>, transform_indices = @transform_2, window_bounds = array<i64: 1, 128>}, {pipeline_mode = #tpu.pipeline_mode<synchronous>, transform_indices = @transform_3, window_bounds = array<i64: 128, 128>}, {pipeline_mode = #tpu.pipeline_mode<synchronous>, transform_indices = @transform_4, window_bounds = array<i64: 1, 128>}, {pipeline_mode = #tpu.pipeline_mode<synchronous>, transform_indices = @transform_5, window_bounds = array<i64: 128, 128>}, {pipeline_mode = #tpu.pipeline_mode<synchronous>, transform_indices = @transform_6, window_bounds = array<i64: 1, 128>}, {transform_indices = @transform_7, window_bounds = array<i64: 16, 128>}]} {
    %c0 = arith.constant 0 : index
    %c0_0 = arith.constant 0 : index
    %0 = vector.load %arg1[%c0, %c0_0] : memref<16x256xf32, #tpu.memory_space<vmem>>, vector<16x256xf32>
    %1 = arith.truncf %0 : vector<16x256xf32> to vector<16x256xbf16>
    %c0_1 = arith.constant 0 : index
    %c0_2 = arith.constant 0 : index
    %2 = vector.load %arg2[%c0_1, %c0_2] : memref<256x128xbf16, #tpu.memory_space<vmem>>, vector<256x128xbf16>
    %cst = arith.constant dense<0.000000e+00> : vector<16x128xf32>
    %3 = tpu.matmul %1, %2, %cst {dimension_numbers = #tpu.dot_dimension_numbers<[1], [0], [0], [1], [0, 0, 1, 1], [], []>} : vector<16x256xbf16>, vector<256x128xbf16>, vector<16x128xf32> -> vector<16x128xf32>
    %c0_3 = arith.constant 0 : index
    %c0_4 = arith.constant 0 : index
    %4 = vector.load %arg3[%c0_3, %c0_4] : memref<1x128xf32, #tpu.memory_space<vmem>>, vector<1x128xf32>
    %5 = vector.broadcast %4 : vector<1x128xf32> to vector<16x128xf32>
    %6 = arith.addf %3, %5 : vector<16x128xf32>
    %cst_5 = arith.constant 0.00999999977 : f32
    %7 = vector.broadcast %cst_5 : f32 to vector<16x128xf32>
    %8 = arith.mulf %7, %6 : vector<16x128xf32>
    %9 = arith.maximumf %6, %8 : vector<16x128xf32>
    %10 = arith.truncf %9 : vector<16x128xf32> to vector<16x128xbf16>
    %c0_6 = arith.constant 0 : index
    %c0_7 = arith.constant 0 : index
    %11 = vector.load %arg4[%c0_6, %c0_7] : memref<128x128xbf16, #tpu.memory_space<vmem>>, vector<128x128xbf16>
    %cst_8 = arith.constant dense<0.000000e+00> : vector<16x128xf32>
    %12 = tpu.matmul %10, %11, %cst_8 {dimension_numbers = #tpu.dot_dimension_numbers<[1], [0], [0], [1], [0, 0, 1, 1], [], []>} : vector<16x128xbf16>, vector<128x128xbf16>, vector<16x128xf32> -> vector<16x128xf32>
    %c0_9 = arith.constant 0 : index
    %c0_10 = arith.constant 0 : index
    %13 = vector.load %arg5[%c0_9, %c0_10] : memref<1x128xf32, #tpu.memory_space<vmem>>, vector<1x128xf32>
    %14 = vector.broadcast %13 : vector<1x128xf32> to vector<16x128xf32>
    %15 = arith.addf %12, %14 : vector<16x128xf32>
    %cst_11 = arith.constant 0.00999999977 : f32
    %16 = vector.broadcast %cst_11 : f32 to vector<16x128xf32>
    %17 = arith.mulf %16, %15 : vector<16x128xf32>
    %18 = arith.maximumf %15, %17 : vector<16x128xf32>
    %19 = arith.truncf %18 : vector<16x128xf32> to vector<16x128xbf16>
    %c0_12 = arith.constant 0 : index
    %c0_13 = arith.constant 0 : index
    %20 = vector.load %arg6[%c0_12, %c0_13] : memref<128x128xbf16, #tpu.memory_space<vmem>>, vector<128x128xbf16>
    %cst_14 = arith.constant dense<0.000000e+00> : vector<16x128xf32>
    %21 = tpu.matmul %19, %20, %cst_14 {dimension_numbers = #tpu.dot_dimension_numbers<[1], [0], [0], [1], [0, 0, 1, 1], [], []>} : vector<16x128xbf16>, vector<128x128xbf16>, vector<16x128xf32> -> vector<16x128xf32>
    %c0_15 = arith.constant 0 : index
    %c0_16 = arith.constant 0 : index
    %22 = vector.load %arg7[%c0_15, %c0_16] : memref<1x128xf32, #tpu.memory_space<vmem>>, vector<1x128xf32>
    %23 = vector.broadcast %22 : vector<1x128xf32> to vector<16x128xf32>
    %24 = arith.addf %21, %23 : vector<16x128xf32>
    %c0_17 = arith.constant 0 : index
    %c0_18 = arith.constant 0 : index
    %25 = vector.load %arg8[%c0_17, %c0_18] : memref<16x128xf32, #tpu.memory_space<vmem>>, vector<16x128xf32>
    tpu.vector_store %arg8[%c0_17, %c0_18], %24 {strides = array<i32>} : memref<16x128xf32, #tpu.memory_space<vmem>>, vector<16x128xf32>,
    return
  }
  func.func @transform_0(%arg0: i32) -> (i32, i32) {
    %c0_i32 = arith.constant 0 : i32
    %c0_i32_0 = arith.constant 0 : i32
    return %arg0, %c0_i32 : i32, i32
  }
  func.func @transform_1(%arg0: i32) -> (i32, i32) {
    %c0_i32 = arith.constant 0 : i32
    %c0_i32_0 = arith.constant 0 : i32
    %c0_i32_1 = arith.constant 0 : i32
    return %c0_i32, %c0_i32_0 : i32, i32
  }
  func.func @transform_2(%arg0: i32) -> (i32, i32) {
    %c0_i32 = arith.constant 0 : i32
    %c0_i32_0 = arith.constant 0 : i32
    %c0_i32_1 = arith.constant 0 : i32
    return %c0_i32, %c0_i32_0 : i32, i32
  }
  func.func @transform_3(%arg0: i32) -> (i32, i32) {
    %c0_i32 = arith.constant 0 : i32
    %c0_i32_0 = arith.constant 0 : i32
    %c0_i32_1 = arith.constant 0 : i32
    return %c0_i32, %c0_i32_0 : i32, i32
  }
  func.func @transform_4(%arg0: i32) -> (i32, i32) {
    %c0_i32 = arith.constant 0 : i32
    %c0_i32_0 = arith.constant 0 : i32
    %c0_i32_1 = arith.constant 0 : i32
    return %c0_i32, %c0_i32_0 : i32, i32
  }
  func.func @transform_5(%arg0: i32) -> (i32, i32) {
    %c0_i32 = arith.constant 0 : i32
    %c0_i32_0 = arith.constant 0 : i32
    %c0_i32_1 = arith.constant 0 : i32
    return %c0_i32, %c0_i32_0 : i32, i32
  }
  func.func @transform_6(%arg0: i32) -> (i32, i32) {
    %c0_i32 = arith.constant 0 : i32
    %c0_i32_0 = arith.constant 0 : i32
    %c0_i32_1 = arith.constant 0 : i32
    return %c0_i32, %c0_i32_0 : i32, i32
  }
  func.func @transform_7(%arg0: i32) -> (i32, i32) {
    %c0_i32 = arith.constant 0 : i32
    %c0_i32_0 = arith.constant 0 : i32
    return %arg0, %c0_i32 : i32, i32
  }
}

</mosaic_0001>

<bundles_post_ra>
// kernel: tpu_custom_call.1
= control target key start
LH: loop header
LB: loop body
LE: loop exit
PB: predicated region body
PF: predicated region fallthrough
CT: control target
= control target key end

     0   :  { %12 = vsyncpa [#allocation3], 0  ;;  %s1680_s0 = inlined_call_operand.hbm [shape: f32[32,256], index: 0, kind: input, shape index: {}]   ;;  %s1681_s1 = inlined_call_operand.hbm [shape: bf16[256,128], index: 1, kind: input, shape index: {}]   ;;  %s1682_s2 = inlined_call_operand.vmem [shape: f32[1,128], index: 2, kind: input, shape index: {}]   ;;  %s1683_s3 = inlined_call_operand.hbm [shape: bf16[128,128], index: 3, kind: input, shape index: {}]   ;;  %s1684_s4 = inlined_call_operand.vmem [shape: f32[1,128], index: 4, kind: input, shape index: {}]   ;;  %s1685_s5 = inlined_call_operand.hbm [shape: bf16[128,128], index: 5, kind: input, shape index: {}]   ;;  %s1686_s6 = inlined_call_operand.vmem [shape: f32[1,128], index: 6, kind: input, shape index: {}]   ;;  %s1687_s7 = inlined_call_operand.hbm [shape: f32[32,128], index: 7, kind: output, shape index: {}]  }
   0x1   :  { %14 = vsyncpa [#allocation3 + $0x1], 0 }
   0x2   :  { %15 = vsyncpa [#allocation6], 0 }
   0x3   :  { %16 = vsyncpa [#allocation9], 0 }
   0x4   :  { %17 = vsyncpa [#allocation4], 0 }
   0x5   :  { %19 = vsyncpa [#allocation4 + $0x1], 0  ;;  %s1378_s24 = smov 0   ;;  %s1380_s25 = smov 0  }
   0x6   :  { %s1382_s26 = smov 0   ;;  %s1384_s27 = smov 0  }
   0x7 LB: > { %s1399_s28 = sadd.s32 4294967295, %s1323_s27   ;;  %s879_s29 = sadd.s32 4294967294, %s1323_s27   ;;  %s1323_s27 = sphi %s1384_s27, %s1713_s27   ;;  %s1319_s26 = sphi %s1382_s26, %s1712_s26   ;;  %s1315_s25 = sphi %s1380_s25, %s1711_s25   ;;  %s1311_s24 = sphi %s1378_s24, %s1710_s24  }
   0x8   : > { %p45_p0 = scmp.ne.s32.totalorder %s1315_s25, %s1311_s24  ;;  %p1688_p1 = scmp.eq.s32.totalorder %s1399_s28, 0 }
   0x9   : > { %p201_p3 = scmp.eq.s32.totalorder %s879_s29, 1  ;;  %p880_p5 = scmp.ge.s32.totalorder %s1323_s27, 1 }
   0xa   : > { %p1408_p4 = por %p1688_p1, %p45_p0  ;;  %p208_p7 = scmp.lt.s32.totalorder %s1323_s27, 3 }
   0xb   : > { %p1413_p6 = por %p201_p3, %p45_p0  ;;  %s1325_s10 = smov [#allocation5]  }
   0xc   : > { %s1692_s30 = scalar_select %p1408_p4, 1, 0 }
   0xd   : > { %s1693_s8 = scalar_select %p1413_p6, 1, 0 }
   0xe   : > { %p1418_p8 = pnand %p880_p5, %p208_p7  ;;  %s220_s11 = sshll.u32 %s1325_s10, 4  ;;  %s1422_s11 = int_to_ptr.vmem [resolvable:$true] %s220_s11 }
   0xf   : > { %1694 = sst [smem:[#allocation15_spill]] %s1693_s8  ;;  %s1326_s13 = smov [#allocation7]  }
  0x10   : > { %s1695_s9 = scalar_select %p1418_p8, 1, 0 }
  0x11   : > { %p1034_p9 = pneg %p1418_p8  ;;  %s236_s14 = sshll.u32 %s1326_s13, 4  ;;  %s1433_s14 = int_to_ptr.vmem [resolvable:$true] %s236_s14 }
  0x12   : > { %s1327_s15 = smov [#allocation8]   ;;  %s1135_s19 = scalar_lea.hbm %s1681_s1, 2048 }
  0x13   : > { %p1429_p11 = pnand %p1034_p9, %p1688_p1  ;;  %s1435_s16 = sshll.u32 %s1327_s15, 4  ;;  %s253_s16 = int_to_ptr.vmem [resolvable:$true] %s1435_s16 }
  0x14   : > { %p1136_p12 = scmp.ne.s32.totalorder %s1681_s1, %s1135_s19  ;;  %p1142_p5 = scmp.lt.u32.totalorder %s1135_s19, %s1681_s1 }
  0x15   : > { %p1445_p13 = pneg %p1429_p11 }
  0x17   : > { %p1138_p0 = pnand %p1445_p13, %p1136_p12 }
  0x19   : > { %p1139_p3 = pneg %p1138_p0 }
  0x1b   : > { %p1144_p7 = pnand %p1142_p5, %p1139_p3 }
  0x1d   : > { %1147 = shalt.err (!%p1144_p7)
}
  0x1e   : > { %s1148_s10 = scalar_lea.vmem %s1422_s11, 2048  ;;  %p1156_p2 = scmp.lt.s32.totalorder %s1422_s11, %s1422_s11 }
  0x1f   : > { %p1149_p9 = scmp.ne.s32.totalorder %s1422_s11, %s1148_s10  ;;  %p1157_p6 = scmp.lt.s32.totalorder %s1148_s10, %s1148_s10 }
  0x21   : > { %p1151_p10 = pnand %p1149_p9, %p1445_p13  ;;  %p1158_p12 = por %p1157_p6, %p1156_p2 }
  0x23   : > { %p1152_p1 = pneg %p1151_p10 }
  0x25   : > { %p1159_p0 = pnand %p1158_p12, %p1152_p1 }
  0x27   : > { %1162 = shalt.err (!%p1159_p0)
}
  0x28   : > { %s1328_s13 = smov 64   ;;  %s1329_s15 = smov 4  }
  0x29   : > { %1037 = dma.hbm_to_vmem [thread:$0]  (!%p1429_p11), %s1681_s1, 2048, %s1422_s11, [#allocation6], %s1328_s13, %s1328_s13, %s1329_s15  }
  0x2a   : > { %s1163_s21 = scalar_lea.hbm %s1683_s3, 1024 }
  0x2b   : > { %p1164_p1 = scmp.ne.s32.totalorder %s1683_s3, %s1163_s21  ;;  %p1170_p10 = scmp.lt.u32.totalorder %s1163_s21, %s1683_s3 }
  0x2d   : > { %p1166_p2 = pnand %p1164_p1, %p1445_p13 }
  0x2f   : > { %p1167_p6 = pneg %p1166_p2 }
  0x31   : > { %p1172_p3 = pnand %p1170_p10, %p1167_p6 }
  0x33   : > { %1175 = shalt.err (!%p1172_p3)
}
  0x34   : > { %s1176_s11 = scalar_lea.vmem %s1433_s14, 1024  ;;  %p1184_p12 = scmp.lt.s32.totalorder %s1433_s14, %s1433_s14 }
  0x35   : > { %p1177_p5 = scmp.ne.s32.totalorder %s1433_s14, %s1176_s11  ;;  %p1185_p0 = scmp.lt.s32.totalorder %s1176_s11, %s1176_s11 }
  0x37   : > { %p1179_p7 = pnand %p1177_p5, %p1445_p13  ;;  %p1186_p1 = por %p1185_p0, %p1184_p12 }
  0x39   : > { %p1180_p9 = pneg %p1179_p7 }
  0x3b   : > { %p1187_p2 = pnand %p1186_p1, %p1180_p9 }
  0x3d   : > { %1190 = shalt.err (!%p1187_p2)
}
  0x3e   : > { %1040 = dma.hbm_to_vmem [thread:$0]  (!%p1429_p11), %s1683_s3, 1024, %s1433_s14, [#allocation6], %s1328_s13, %s1328_s13, %s1329_s15  }
  0x3f   : > { %s1191_s20 = scalar_lea.hbm %s1685_s5, 1024 }
  0x40   : > { %p1192_p6 = scmp.ne.s32.totalorder %s1685_s5, %s1191_s20  ;;  %p1198_p5 = scmp.lt.u32.totalorder %s1191_s20, %s1685_s5 }
  0x42   : > { %p1194_p10 = pnand %p1192_p6, %p1445_p13 }
  0x44   : > { %p1195_p3 = pneg %p1194_p10 }
  0x46   : > { %p1200_p7 = pnand %p1198_p5, %p1195_p3 }
  0x48   : > { %1203 = shalt.err (!%p1200_p7)
}
  0x49   : > { %s1204_s11 = scalar_lea.vmem %s253_s16, 1024  ;;  %p1212_p1 = scmp.lt.s32.totalorder %s253_s16, %s253_s16 }
  0x4a   : > { %p1205_p9 = scmp.ne.s32.totalorder %s253_s16, %s1204_s11  ;;  %p1213_p2 = scmp.lt.s32.totalorder %s1204_s11, %s1204_s11 }
  0x4c   : > { %p1207_p12 = pnand %p1205_p9, %p1445_p13  ;;  %p1214_p4 = por %p1213_p2, %p1212_p1 }
  0x4e   : > { %p1208_p0 = pneg %p1207_p12 }
  0x50   : > { %p1215_p8 = pnand %p1214_p4, %p1208_p0 }
  0x52   : > { %1218 = shalt.err (!%p1215_p8)
}
  0x53   : > { %1043 = dma.hbm_to_vmem [thread:$0]  (!%p1429_p11), %s1685_s5, 1024, %s253_s16, [#allocation9], %s1328_s13, %s1328_s13, %s1329_s15  }
  0x54   : > { %s1518_s22 = sadd.s32 1, %s1323_s27   ;;  %s32_s17 = sadd.s32 1, %s1319_s26 }
  0x55   : > { %s29_s12 = ssub.s32 %s1323_s27, %s1518_s22  ;;  %p39_p8 = scmp.ne.s32.totalorder %s1319_s26, %s1315_s25 }
  0x56   : > { %p30_p4 = scmp.eq.s32.totalorder %s29_s12, 0  ;;  %p40_p13 = scmp.eq.s32.totalorder %s1323_s27, 0 }
  0x57   : > { %p1055_p6 = scmp.lt.s32.totalorder %s1323_s27, 2  ;;  %p1698_p3 = scmp.eq.s32.totalorder %s1399_s28, 1 }
  0x58   : > { %s1528_s18 = scalar_select %p30_p4, %s1319_s26, %s32_s17  }
  0x59   : > { %p41_p10 = por %p40_p13, %p39_p8  ;;  %p1532_p5 = por %p1698_p3, %p39_p8 }
  0x5a   : > { %s269_s20 = sand.u32 1, %s1319_s26   ;;  %s936_s21 = sshll.u32 %s1323_s27, 9 }
  0x5b   : > { %s885_s16 = sshll.u32 %s269_s20, 5  ;;  %s1541_s23 = scalar_lea.hbm %s1680_s0, %s936_s21 }
  0x5c   : > { %s273_s29 = scalar_lea.vmem [#allocation2], %s885_s16  ;;  %p1543_p11 = pnand %p1055_p6, %p41_p10 }
  0x5d   : > { %s281_s10 = sshll.u32 %s273_s29, 4  ;;  %s1549_s14 = scalar_lea.sflag [#allocation3], %s269_s20  ;;  %s1547_s10 = int_to_ptr.vmem [resolvable:$true] %s281_s10 }
  0x5e   : > { %s1219_s8 = scalar_lea.hbm %s1541_s23, 512  ;;  %p1221_p9 = pneg %p1543_p11 }
  0x5f   : > { %p1220_p7 = scmp.ne.s32.totalorder %s1541_s23, %s1219_s8  ;;  %s1224_s21 = scalar_lea.hbm %s1680_s0, 1024 }
  0x60   : > { %p1225_p1 = scmp.lt.u32.totalorder %s1541_s23, %s1680_s0  ;;  %p1226_p2 = scmp.lt.u32.totalorder %s1224_s21, %s1219_s8 }
  0x61   : > { %p1222_p12 = pnand %p1221_p9, %p1220_p7  ;;  %p1228_p8 = scmp.lt.u32.totalorder %s1219_s8, %s1541_s23 }
  0x62   : > { %p1227_p4 = por %p1226_p2, %p1225_p1 }
  0x63   : > { %p1223_p0 = pneg %p1222_p12 }
  0x64   : > { %p1229_p13 = por %p1228_p8, %p1227_p4 }
  0x66   : > { %p1230_p6 = pnand %p1229_p13, %p1223_p0 }
  0x68   : > { %1233 = shalt.err (!%p1230_p6)
}
  0x69   : > { %s1234_s20 = scalar_lea.vmem %s1547_s10, 512  ;;  %s1330_s15 = smov [#allocation2]  }
  0x6a   : > { %p1235_p10 = scmp.ne.s32.totalorder %s1547_s10, %s1234_s20  ;;  %s1239_s29 = sshll.u32 %s1330_s15, 4  ;;  %s1240_s29 = int_to_ptr.vmem [resolvable:$false] %s1239_s29 }
  0x6b   : > { %s1241_s12 = scalar_lea.vmem %s1240_s29, 1024  ;;  %p1242_p12 = scmp.lt.s32.totalorder %s1547_s10, %s1240_s29 }
  0x6c   : > { %p1237_p3 = pnand %p1235_p10, %p1221_p9  ;;  %p1243_p1 = scmp.lt.s32.totalorder %s1241_s12, %s1234_s20 }
  0x6e   : > { %p1238_p7 = pneg %p1237_p3  ;;  %p1244_p2 = por %p1243_p1, %p1242_p12 }
  0x70   : > { %p1245_p4 = pnand %p1244_p2, %p1238_p7 }
  0x72   : > { %1248 = shalt.err (!%p1245_p4)
}
  0x73   : > { %s1331_s8 = smov 256   ;;  %s1332_s17 = smov 16  }
  0x74   : > { %1047 = dma.hbm_to_vmem [thread:$0]  (!%p1543_p11), %s1541_s23, 512, %s1547_s10, %s1549_s14, %s1331_s8, %s1331_s8, %s1332_s17  }
  0x75   : > { %p1701_p9 = scmp.ne.s32.totalorder %s1695_s9, 0 }
  0x76   : > { %s1580_s21 = sand.u32 (!%p1701_p9), 1, %s1315_s25   ;;  %p1702_p0 = scmp.ne.s32.totalorder (!%p1701_p9), %s1692_s30, 0 }
  0x77   : > { %293 = sbr.rel (%p1701_p9) target bundleno = 845 (0x34d), region = 48  ;;  %s890_s16 = sshll.u32 (!%p1701_p9), %s1580_s21, 5 }
  0x78   : > { %s296_s13 = scalar_lea.sflag (!%p1701_p9), [#allocation3], %s1580_s21  ;;  %s1584_s20 = scalar_lea.vmem (!%p1701_p9), [#allocation2], %s890_s16 }
  0x7e   : > { %1294 = dma.done.wait (%p1702_p0), %s296_s13, 512  }
  0x7f   : > { %1296 = vsyncadd (%p1702_p0), %s296_s13, 4294966784  ;;  %p1703_p11 = scmp.eq.s32.totalorder %s1399_s28, 0 }
  0x81   : > { %1298 = dma.done.wait (%p1703_p11), [#allocation6], 3072   ;;  %p1704_p8 = pmov %p1703_p11 }
  0x83   : > { %1300 = vsyncadd (%p1704_p8), [#allocation6], 4294964224  ;;  %p1705_p13 = pmov %p1704_p8 }
  0x84   : > { %p1706_p6 = pmov %p1704_p8 }
  0x85   : > { %1302 = dma.done.wait (%p1705_p13), [#allocation9], 1024  }
  0x86   : > { %1304 = vsyncadd (%p1706_p6), [#allocation9], 4294966272  ;;  %v1333_v0 = vmov 0.0   ;;  %v1103_v1 = vld [vmem:[#allocation5 + $0x40] sm:$0xff]   ;;  %v1105_v3 = vld [vmem:[#allocation5 + $0x48] sm:$0xff]   ;;  %vm1334_vm0 = vmmov 0  }
  0x87   : > { %978 = vmatprep.subr.bf16.mxu1 %v1333_v0  ;;  %v1104_v2 = vld [vmem:[#allocation5] sm:$0xff]   ;;  %938 = vmatprep.subr.bf16.mxu0 %v1103_v1  ;;  %v1106_v4 = vld [vmem:[#allocation5 + $0x8] sm:$0xff]   ;;  %v1107_v5 = vld [vmem:[#allocation5 + $0x50] sm:$0xff]   ;;  %s894_s11 = sshll.u32 %s1580_s21, 4  ;;  %s937_s8 = sshll.u32 %s1399_s28, 8 }
  0x88   : > { %939 = vmatpush3.bf16.msra.mxu0 %v1104_v2  ;;  %v1108_v6 = vld [vmem:[#allocation5 + $0x10] sm:$0xff]   ;;  %v1109_v7 = vld [vmem:[#allocation5 + $0x58] sm:$0xff]   ;;  %v1111_v9 = vld [vmem:[#allocation5 + $0x60] sm:$0xff]   ;;  %994 = vmatprep.mubr.msk.bf16.mxu1 %vm1334_vm0, %v1333_v0  ;;  %s341_s29 = scalar_lea.vmem [#allocation10], %s894_s11  ;;  %s1636_s13 = scalar_lea.hbm %s1687_s7, %s937_s8 }
  0x89   : > { %940 = vmatprep.subr.bf16.mxu0 %v1105_v3  ;;  %v1110_v8 = vld [vmem:[#allocation5 + $0x18] sm:$0xff]   ;;  %v1112_v10 = vld [vmem:[#allocation5 + $0x20] sm:$0xff]   ;;  %v1113_v11 = vld [vmem:[#allocation5 + $0x68] sm:$0xff]   ;;  %s777_s12 = sshll.u32 %s341_s29, 4  ;;  %s1335_s30 = smov [#allocation10]   ;;  %s1631_s12 = int_to_ptr.vmem [resolvable:$true] %s777_s12 }
  0x8a   : > { %v346_v12 = vld [vmem:[%s1584_s20 + $0x8] sm:$0xff]  ;;  %v348_v13 = vld [vmem:[%s1584_s20 + $0x18] sm:$0xff]  ;;  %v1119_v16 = vld [vmem:[#allocation7] sm:$0xff]   ;;  %s1249_s28 = scalar_lea.vmem %s1631_s12, 256  ;;  %s1253_s9 = sshll.u32 %s1335_s30, 4  ;;  %s1254_s9 = int_to_ptr.vmem [resolvable:$false] %s1253_s9 }
  0x8b   : > { %v1114_v14 = vld [vmem:[#allocation5 + $0x28] sm:$0xff]   ;;  %v350_v15 = vpack.c.bf16 %v348_v13, %v346_v12  ;;  %v1115_v17 = vld [vmem:[#allocation5 + $0x70] sm:$0xff]   ;;  %979 = vmatpush3.bf16.msra.mxu1 %v1119_v16  ;;  %v1117_v20 = vld [vmem:[#allocation5 + $0x78] sm:$0xff]   ;;  %p1250_p10 = scmp.ne.s32.totalorder %s1631_s12, %s1249_s28  ;;  %s1255_s23 = scalar_lea.vmem %s1254_s9, 512 }
  0x8c   : > { %941 = vmatpush3.bf16.msra.mxu0 %v1106_v4  ;;  %v1120_v18 = vld [vmem:[#allocation7 + $0x8] sm:$0xff]   ;;  %v1116_v19 = vld [vmem:[#allocation5 + $0x30] sm:$0xff]   ;;  %980 = vmatprep.subr.bf16.mxu1 %v1333_v0  ;;  %v1118_v22 = vld [vmem:[#allocation5 + $0x38] sm:$0xff]   ;;  %p1256_p12 = scmp.lt.s32.totalorder %s1631_s12, %s1254_s9  ;;  %p1257_p1 = scmp.lt.s32.totalorder %s1255_s23, %s1249_s28 }
  0x8d   : > { %942 = vmatprep.subr.bf16.mxu0 %v1107_v5  ;;  %518 = vmatprep.mubr.bf16.mxu0 %v350_v15  ;;  %v1121_v21 = vld [vmem:[#allocation7 + $0x10] sm:$0xff]   ;;  %v345_v23 = vld [vmem:[%s1584_s20] sm:$0xff]  ;;  %v1122_v25 = vld [vmem:[#allocation7 + $0x18] sm:$0xff]   ;;  %p1251_p3 = pnand %p1250_p10, %p1532_p5 }
  0x8e   : > { %v347_v24 = vld [vmem:[%s1584_s20 + $0x10] sm:$0xff]  ;;  %v1123_v27 = vld [vmem:[#allocation7 + $0x20] sm:$0xff]   ;;  %v1124_v28 = vld [vmem:[#allocation7 + $0x28] sm:$0xff]   ;;  %s764_s20 = scalar_lea.sflag [#allocation4], %s1580_s21  ;;  %p1258_p2 = por %p1257_p1, %p1256_p12 }
  0x8f   : > { %981 = vmatpush3.bf16.msra.mxu1 %v1120_v18  ;;  %v349_v26 = vpack.c.bf16 %v347_v24, %v345_v23  ;;  %v1125_v29 = vld [vmem:[#allocation7 + $0x30] sm:$0xff]   ;;  %v1126_v30 = vld [vmem:[#allocation7 + $0x38] sm:$0xff]   ;;  %v1127_v31 = vld [vmem:[#allocation8] sm:$0xff]   ;;  %p1252_p7 = pneg %p1251_p3 }
  0x90   : > { %943 = vmatpush3.bf16.msra.mxu0 %v1108_v6  ;;  %982 = vmatprep.subr.bf16.mxu1 %v1333_v0  ;;  %v1128_v32 = vld [vmem:[#allocation8 + $0x8] sm:$0xff]   ;;  %v1129_v33 = vld [vmem:[#allocation8 + $0x10] sm:$0xff]   ;;  %v1130_v34 = vld [vmem:[#allocation8 + $0x18] sm:$0xff]  }
  0x91   : > { %944 = vmatprep.subr.bf16.mxu0 %v1109_v7  ;;  %v1131_v35 = vld [vmem:[#allocation8 + $0x20] sm:$0xff]   ;;  %v1132_v50 = vld [vmem:[#allocation8 + $0x28] sm:$0xff]   ;;  %v1133_v51 = vld [vmem:[#allocation8 + $0x30] sm:$0xff]   ;;  %p1259_p4 = pnand %p1258_p2, %p1252_p7 }
  0x92   : > { %v895_v37 = vld [vmem:[%s1682_s2] ss:$0 sm:$0xff]  ;;  %v1134_v52 = vld [vmem:[#allocation8 + $0x38] sm:$0xff]  }
  0x93   : > { %983 = vmatpush3.bf16.msra.mxu1 %v1121_v21  ;;  %v912_v53 = vld [vmem:[%s1684_s4] ss:$0 sm:$0xff] }
  0x94   : > { %945 = vmatpush3.bf16.msra.mxu0 %v1110_v8  ;;  %984 = vmatprep.subr.bf16.mxu1 %v1333_v0 }
  0x95   : > { %946 = vmatprep.subr.bf16.mxu0 %v1111_v9 }
  0x97   : > { %985 = vmatpush3.bf16.msra.mxu1 %v1122_v25 }
  0x98   : > { %947 = vmatpush3.bf16.msra.mxu0 %v1112_v10  ;;  %986 = vmatprep.subr.bf16.mxu1 %v1333_v0 }
  0x99   : > { %948 = vmatprep.subr.bf16.mxu0 %v1113_v11 }
  0x9b   : > { %987 = vmatpush3.bf16.msra.mxu1 %v1123_v27 }
  0x9c   : > { %949 = vmatpush3.bf16.msra.mxu0 %v1114_v14  ;;  %988 = vmatprep.subr.bf16.mxu1 %v1333_v0 }
  0x9d   : > { %950 = vmatprep.subr.bf16.mxu0 %v1115_v17 }
  0x9f   : > { %989 = vmatpush3.bf16.msra.mxu1 %v1124_v28 }
  0xa0   : > { %951 = vmatpush3.bf16.msra.mxu0 %v1116_v19  ;;  %990 = vmatprep.subr.bf16.mxu1 %v1333_v0 }
  0xa1   : > { %952 = vmatprep.subr.bf16.mxu0 %v1117_v20 }
  0xa3   : > { %991 = vmatpush3.bf16.msra.mxu1 %v1125_v29 }
  0xa4   : > { %953 = vmatpush3.bf16.msra.mxu0 %v1118_v22  ;;  %992 = vmatprep.subr.bf16.mxu1 %v1333_v0 }
  0xa5   : > { %998 = vmatprep.subr.bf16.mxu0 %v1333_v0 }
  0xa7   : > { %519 = vmatmul.mubr.bf16.vlgmr.msra.gmra.mrb[0].mxu0 %v349_v26  ;;  %993 = vmatpush3.bf16.msra.mxu1 %v1126_v30 }
  0xa8   : > { %1014 = vmatprep.mubr.msk.bf16.mxu0 %vm1334_vm0, %v1333_v0  ;;  %999 = vmatpush3.bf16.msra.mxu0 %v1127_v31 }
  0xa9   : > { %1000 = vmatprep.subr.bf16.mxu0 %v1333_v0 }
  0xac   : > { %1001 = vmatpush3.bf16.msra.mxu0 %v1128_v32 }
  0xad   : > { %1002 = vmatprep.subr.bf16.mxu0 %v1333_v0 }
  0xb0   : > { %1003 = vmatpush3.bf16.msra.mxu0 %v1129_v33 }
  0xb1   : > { %1004 = vmatprep.subr.bf16.mxu0 %v1333_v0 }
  0xb4   : > { %1005 = vmatpush3.bf16.msra.mxu0 %v1130_v34 }
  0xb5   : > { %1006 = vmatprep.subr.bf16.mxu0 %v1333_v0 }
  0xb8   : > { %1007 = vmatpush3.bf16.msra.mxu0 %v1131_v35 }
  0xb9   : > { %1008 = vmatprep.subr.bf16.mxu0 %v1333_v0 }
  0xbc   : > { %1009 = vmatpush3.bf16.msra.mxu0 %v1132_v50 }
  0xbd   : > { %1010 = vmatprep.subr.bf16.mxu0 %v1333_v0 }
  0xc0   : > { %1011 = vmatpush3.bf16.msra.mxu0 %v1133_v51 }
  0xc1   : > { %1012 = vmatprep.subr.bf16.mxu0 %v1333_v0  ;;  %v921_v0 = vld [vmem:[%s1686_s6] ss:$0 sm:$0xff] }
  0xc4   : > { %1013 = vmatpush3.bf16.msra.mxu0 %v1134_v52 }
 0x17a   : > { %v954_v36 = vpop.f32.mrb[0].mxu0 }
 0x17b   : > { %v955_v38 = vpop.f32.mrb[1].mxu0 }
 0x17c   : > { %v956_v39 = vadd.f32 %v955_v38, %v954_v36  ;;  %v957_v40 = vpop.f32.mrb[2].mxu0 }
 0x17d   : > { %v958_v41 = vpop.f32.mrb[3].mxu0 }
 0x17e   : > { %v521_v42 = vadd.f32 %v956_v39, %v895_v37  ;;  %v959_v43 = vadd.f32 %v958_v41, %v957_v40 }
 0x180   : > { %v527_v44 = vmul.f32 0.01, %v521_v42  ;;  %v524_v45 = vadd.f32 %v959_v43, %v895_v37 }
 0x182   : > { %v528_v46 = vmul.f32 0.01, %v524_v45  ;;  %v529_v47 = vmax.f32 %v521_v42, %v527_v44 }
 0x184   : > { %v530_v48 = vmax.f32 %v524_v45, %v528_v46 }
 0x186   : > { %v531_v49 = vpack.c.bf16 %v530_v48, %v529_v47 }
 0x188   : > { %995 = vmatmul.mubr.bf16.vlgmr.msra.gmra.mrb[0].mxu1 %v531_v49 }
 0x25b   : > { %v637_v54 = vpop.f32.mrb[0].mxu1 }
 0x25c   : > { %v638_v55 = vadd.f32 %v912_v53, %v637_v54  ;;  %v996_v56 = vpop.f32.mrb[1].mxu1 }
 0x25d   : > { %v640_v57 = vpop.f32.mrb[2].mxu1 }
 0x25e   : > { %v644_v58 = vmul.f32 0.01, %v638_v55  ;;  %v641_v59 = vadd.f32 %v912_v53, %v640_v57  ;;  %v997_v60 = vpop.f32.mrb[3].mxu1 }
 0x260   : > { %v645_v61 = vmul.f32 0.01, %v641_v59  ;;  %v646_v62 = vmax.f32 %v638_v55, %v644_v58 }
 0x262   : > { %v647_v63 = vmax.f32 %v641_v59, %v645_v61 }
 0x264   : > { %v648_v1 = vpack.c.bf16 %v647_v63, %v646_v62 }
 0x266   : > { %1015 = vmatmul.mubr.bf16.vlgmr.msra.gmra.mrb[4].mxu0 %v648_v1 }
 0x339   : > { %v754_v2 = vpop.f32.mrb[4].mxu0 }
 0x33a   : > { %v755_v3 = vadd.f32 %v921_v0, %v754_v2  ;;  %v1016_v4 = vpop.f32.mrb[5].mxu0 }
 0x33b   : > { %v757_v5 = vpop.f32.mrb[6].mxu0 }
 0x33c   : > { %761 = vst [vmem:[%s341_s29] sm:$0xff] %v755_v3  ;;  %v758_v6 = vadd.f32 %v921_v0, %v757_v5  ;;  %v1017_v7 = vpop.f32.mrb[7].mxu0 }
 0x33e   : > { %762 = vst [vmem:[%s341_s29 + $0x8] sm:$0xff] %v758_v6 }
 0x33f   : > { %1262 = shalt.err (!%p1259_p4)
}
 0x340   : > { %s1263_s10 = scalar_lea.hbm %s1636_s13, 256  ;;  %s1267_s15 = scalar_lea.hbm %s1687_s7, 512 }
 0x341   : > { %p1264_p9 = scmp.ne.s32.totalorder %s1636_s13, %s1263_s10  ;;  %p1268_p8 = scmp.lt.u32.totalorder %s1636_s13, %s1687_s7 }
 0x342   : > { %p1269_p13 = scmp.lt.u32.totalorder %s1267_s15, %s1263_s10  ;;  %p1271_p10 = scmp.lt.u32.totalorder %s1263_s10, %s1636_s13 }
 0x343   : > { %p1265_p0 = pnand %p1264_p9, %p1532_p5 }
 0x344   : > { %p1270_p6 = por %p1269_p13, %p1268_p8 }
 0x345   : > { %p1266_p11 = pneg %p1265_p0 }
 0x346   : > { %p1272_p3 = por %p1271_p10, %p1270_p6 }
 0x348   : > { %p1273_p7 = pnand %p1272_p3, %p1266_p11 }
 0x34a   : > { %1276 = shalt.err (!%p1273_p7)
}
 0x34b   : > { %s1336_s17 = smov 128   ;;  %s1337_s16 = smov 8  }
 0x34c   : > { %1032 = dma.vmem_to_hbm [thread:$0]  (%p1532_p5), %s1631_s12, 256, %s1636_s13, %s764_s20, %s1336_s17, %s1336_s17, %s1337_s16  }
 0x34d PF: > { %s1707_s28 = sld [smem:[#allocation15_spill]]  ;;  %s792_s30 = sand.u32 1, %s1311_s24  }
 0x34e   : > { %p1709_p1 = scmp.ge.s32.totalorder %s1323_s27, 2  ;;  %s793_s9 = scalar_lea.sflag [#allocation4], %s792_s30 }
 0x353   : > { %p1708_p12 = scmp.ne.s32.totalorder %s1707_s28, 0 }
 0x355   : > { %p1049_p2 = pnand %p1709_p1, %p1708_p12 }
 0x357   : > { %1306 = dma.done.wait (!%p1049_p2), %s793_s9, 256  }
 0x358   : > { %1308 = vsyncadd (!%p1049_p2), %s793_s9, 4294967040  ;;  %p22_p4 = scmp.ge.s32.totalorder %s1518_s22, 4   ;;  %s1710_s24 = smov %s1315_s25 }
 0x359   : > { %s1711_s25 = smov %s1319_s26  ;;  %s1712_s26 = smov %s1528_s18 }
 0x35a   : > { %s1713_s27 = smov %s1518_s22  ;;  %24 = sbr.rel (!%p22_p4) target bundleno = 7 (0x7), region = 105 }
 0x361   :  { %798 = vsyncpa [#allocation3], 1 }
 0x362   :  { %800 = vsyncpa [#allocation3 + $0x1], 1 }
 0x363   :  { %801 = vsyncpa [#allocation6], 1 }
 0x364   :  { %802 = vsyncpa [#allocation9], 1 }
 0x365   :  { %803 = vsyncpa [#allocation4], 1 }
 0x366   :  { %805 = vsyncpa [#allocation4 + $0x1], 1 }

// kernel: tpu_custom_call.1
= control target key start
LH: loop header
LB: loop body
LE: loop exit
PB: predicated region body
PF: predicated region fallthrough
CT: control target
= control target key end

     0   :  { %12 = vsyncpa [#allocation3], 0  ;;  %s1680_s0 = inlined_call_operand.hbm [shape: f32[32,256], index: 0, kind: input, shape index: {}]   ;;  %s1681_s1 = inlined_call_operand.hbm [shape: bf16[256,128], index: 1, kind: input, shape index: {}]   ;;  %s1682_s2 = inlined_call_operand.vmem [shape: f32[1,128], index: 2, kind: input, shape index: {}]   ;;  %s1683_s3 = inlined_call_operand.hbm [shape: bf16[128,128], index: 3, kind: input, shape index: {}]   ;;  %s1684_s4 = inlined_call_operand.vmem [shape: f32[1,128], index: 4, kind: input, shape index: {}]   ;;  %s1685_s5 = inlined_call_operand.hbm [shape: bf16[128,128], index: 5, kind: input, shape index: {}]   ;;  %s1686_s6 = inlined_call_operand.vmem [shape: f32[1,128], index: 6, kind: input, shape index: {}]   ;;  %s1687_s7 = inlined_call_operand.hbm [shape: f32[32,128], index: 7, kind: output, shape index: {}]  }
   0x1   :  { %14 = vsyncpa [#allocation3 + $0x1], 0 }
   0x2   :  { %15 = vsyncpa [#allocation6], 0 }
   0x3   :  { %16 = vsyncpa [#allocation9], 0 }
   0x4   :  { %17 = vsyncpa [#allocation4], 0 }
   0x5   :  { %19 = vsyncpa [#allocation4 + $0x1], 0  ;;  %s1378_s24 = smov 0   ;;  %s1380_s25 = smov 0  }
   0x6   :  { %s1382_s26 = smov 0   ;;  %s1384_s27 = smov 0  }
   0x7 LB: > { %s1399_s28 = sadd.s32 4294967295, %s1323_s27   ;;  %s879_s29 = sadd.s32 4294967294, %s1323_s27   ;;  %s1323_s27 = sphi %s1384_s27, %s1713_s27   ;;  %s1319_s26 = sphi %s1382_s26, %s1712_s26   ;;  %s1315_s25 = sphi %s1380_s25, %s1711_s25   ;;  %s1311_s24 = sphi %s1378_s24, %s1710_s24  }
   0x8   : > { %p45_p0 = scmp.ne.s32.totalorder %s1315_s25, %s1311_s24  ;;  %p1688_p1 = scmp.eq.s32.totalorder %s1399_s28, 0 }
   0x9   : > { %p201_p3 = scmp.eq.s32.totalorder %s879_s29, 1  ;;  %p880_p5 = scmp.ge.s32.totalorder %s1323_s27, 1 }
   0xa   : > { %p1408_p4 = por %p1688_p1, %p45_p0  ;;  %p208_p7 = scmp.lt.s32.totalorder %s1323_s27, 3 }
   0xb   : > { %p1413_p6 = por %p201_p3, %p45_p0  ;;  %s1325_s10 = smov [#allocation5]  }
   0xc   : > { %s1692_s30 = scalar_select %p1408_p4, 1, 0 }
   0xd   : > { %s1693_s8 = scalar_select %p1413_p6, 1, 0 }
   0xe   : > { %p1418_p8 = pnand %p880_p5, %p208_p7  ;;  %s220_s11 = sshll.u32 %s1325_s10, 4  ;;  %s1422_s11 = int_to_ptr.vmem [resolvable:$true] %s220_s11 }
   0xf   : > { %1694 = sst [smem:[#allocation15_spill]] %s1693_s8  ;;  %s1326_s13 = smov [#allocation7]  }
  0x10   : > { %s1695_s9 = scalar_select %p1418_p8, 1, 0 }
  0x11   : > { %p1034_p9 = pneg %p1418_p8  ;;  %s236_s14 = sshll.u32 %s1326_s13, 4  ;;  %s1433_s14 = int_to_ptr.vmem [resolvable:$true] %s236_s14 }
  0x12   : > { %s1327_s15 = smov [#allocation8]   ;;  %s1135_s19 = scalar_lea.hbm %s1681_s1, 2048 }
  0x13   : > { %p1429_p11 = pnand %p1034_p9, %p1688_p1  ;;  %s1435_s16 = sshll.u32 %s1327_s15, 4  ;;  %s253_s16 = int_to_ptr.vmem [resolvable:$true] %s1435_s16 }
  0x14   : > { %p1136_p12 = scmp.ne.s32.totalorder %s1681_s1, %s1135_s19  ;;  %p1142_p5 = scmp.lt.u32.totalorder %s1135_s19, %s1681_s1 }
  0x15   : > { %p1445_p13 = pneg %p1429_p11 }
  0x17   : > { %p1138_p0 = pnand %p1445_p13, %p1136_p12 }
  0x19   : > { %p1139_p3 = pneg %p1138_p0 }
  0x1b   : > { %p1144_p7 = pnand %p1142_p5, %p1139_p3 }
  0x1d   : > { %1147 = shalt.err (!%p1144_p7)
}
  0x1e   : > { %s1148_s10 = scalar_lea.vmem %s1422_s11, 2048  ;;  %p1156_p2 = scmp.lt.s32.totalorder %s1422_s11, %s1422_s11 }
  0x1f   : > { %p1149_p9 = scmp.ne.s32.totalorder %s1422_s11, %s1148_s10  ;;  %p1157_p6 = scmp.lt.s32.totalorder %s1148_s10, %s1148_s10 }
  0x21   : > { %p1151_p10 = pnand %p1149_p9, %p1445_p13  ;;  %p1158_p12 = por %p1157_p6, %p1156_p2 }
  0x23   : > { %p1152_p1 = pneg %p1151_p10 }
  0x25   : > { %p1159_p0 = pnand %p1158_p12, %p1152_p1 }
  0x27   : > { %1162 = shalt.err (!%p1159_p0)
}
  0x28   : > { %s1328_s13 = smov 64   ;;  %s1329_s15 = smov 4  }
  0x29   : > { %1037 = dma.hbm_to_vmem [thread:$0]  (!%p1429_p11), %s1681_s1, 2048, %s1422_s11, [#allocation6], %s1328_s13, %s1328_s13, %s1329_s15  }
  0x2a   : > { %s1163_s21 = scalar_lea.hbm %s1683_s3, 1024 }
  0x2b   : > { %p1164_p1 = scmp.ne.s32.totalorder %s1683_s3, %s1163_s21  ;;  %p1170_p10 = scmp.lt.u32.totalorder %s1163_s21, %s1683_s3 }
  0x2d   : > { %p1166_p2 = pnand %p1164_p1, %p1445_p13 }
  0x2f   : > { %p1167_p6 = pneg %p1166_p2 }
  0x31   : > { %p1172_p3 = pnand %p1170_p10, %p1167_p6 }
  0x33   : > { %1175 = shalt.err (!%p1172_p3)
}
  0x34   : > { %s1176_s11 = scalar_lea.vmem %s1433_s14, 1024  ;;  %p1184_p12 = scmp.lt.s32.totalorder %s1433_s14, %s1433_s14 }
  0x35   : > { %p1177_p5 = scmp.ne.s32.totalorder %s1433_s14, %s1176_s11  ;;  %p1185_p0 = scmp.lt.s32.totalorder %s1176_s11, %s1176_s11 }
  0x37   : > { %p1179_p7 = pnand %p1177_p5, %p1445_p13  ;;  %p1186_p1 = por %p1185_p0, %p1184_p12 }
  0x39   : > { %p1180_p9 = pneg %p1179_p7 }
  0x3b   : > { %p1187_p2 = pnand %p1186_p1, %p1180_p9 }
  0x3d   : > { %1190 = shalt.err (!%p1187_p2)
}
  0x3e   : > { %1040 = dma.hbm_to_vmem [thread:$0]  (!%p1429_p11), %s1683_s3, 1024, %s1433_s14, [#allocation6], %s1328_s13, %s1328_s13, %s1329_s15  }
  0x3f   : > { %s1191_s20 = scalar_lea.hbm %s1685_s5, 1024 }
  0x40   : > { %p1192_p6 = scmp.ne.s32.totalorder %s1685_s5, %s1191_s20  ;;  %p1198_p5 = scmp.lt.u32.totalorder %s1191_s20, %s1685_s5 }
  0x42   : > { %p1194_p10 = pnand %p1192_p6, %p1445_p13 }
  0x44   : > { %p1195_p3 = pneg %p1194_p10 }
  0x46   : > { %p1200_p7 = pnand %p1198_p5, %p1195_p3 }
  0x48   : > { %1203 = shalt.err (!%p1200_p7)
}
  0x49   : > { %s1204_s11 = scalar_lea.vmem %s253_s16, 1024  ;;  %p1212_p1 = scmp.lt.s32.totalorder %s253_s16, %s253_s16 }
  0x4a   : > { %p1205_p9 = scmp.ne.s32.totalorder %s253_s16, %s1204_s11  ;;  %p1213_p2 = scmp.lt.s32.totalorder %s1204_s11, %s1204_s11 }
  0x4c   : > { %p1207_p12 = pnand %p1205_p9, %p1445_p13  ;;  %p1214_p4 = por %p1213_p2, %p1212_p1 }
  0x4e   : > { %p1208_p0 = pneg %p1207_p12 }
  0x50   : > { %p1215_p8 = pnand %p1214_p4, %p1208_p0 }
  0x52   : > { %1218 = shalt.err (!%p1215_p8)
}
  0x53   : > { %1043 = dma.hbm_to_vmem [thread:$0]  (!%p1429_p11), %s1685_s5, 1024, %s253_s16, [#allocation9], %s1328_s13, %s1328_s13, %s1329_s15  }
  0x54   : > { %s1518_s22 = sadd.s32 1, %s1323_s27   ;;  %s32_s17 = sadd.s32 1, %s1319_s26 }
  0x55   : > { %s29_s12 = ssub.s32 %s1323_s27, %s1518_s22  ;;  %p39_p8 = scmp.ne.s32.totalorder %s1319_s26, %s1315_s25 }
  0x56   : > { %p30_p4 = scmp.eq.s32.totalorder %s29_s12, 0  ;;  %p40_p13 = scmp.eq.s32.totalorder %s1323_s27, 0 }
  0x57   : > { %p1055_p6 = scmp.lt.s32.totalorder %s1323_s27, 2  ;;  %p1698_p3 = scmp.eq.s32.totalorder %s1399_s28, 1 }
  0x58   : > { %s1528_s18 = scalar_select %p30_p4, %s1319_s26, %s32_s17  }
  0x59   : > { %p41_p10 = por %p40_p13, %p39_p8  ;;  %p1532_p5 = por %p1698_p3, %p39_p8 }
  0x5a   : > { %s269_s20 = sand.u32 1, %s1319_s26   ;;  %s936_s21 = sshll.u32 %s1323_s27, 9 }
  0x5b   : > { %s885_s16 = sshll.u32 %s269_s20, 5  ;;  %s1541_s23 = scalar_lea.hbm %s1680_s0, %s936_s21 }
  0x5c   : > { %s273_s29 = scalar_lea.vmem [#allocation2], %s885_s16  ;;  %p1543_p11 = pnand %p1055_p6, %p41_p10 }
  0x5d   : > { %s281_s10 = sshll.u32 %s273_s29, 4  ;;  %s1549_s14 = scalar_lea.sflag [#allocation3], %s269_s20  ;;  %s1547_s10 = int_to_ptr.vmem [resolvable:$true] %s281_s10 }
  0x5e   : > { %s1219_s8 = scalar_lea.hbm %s1541_s23, 512  ;;  %p1221_p9 = pneg %p1543_p11 }
  0x5f   : > { %p1220_p7 = scmp.ne.s32.totalorder %s1541_s23, %s1219_s8  ;;  %s1224_s21 = scalar_lea.hbm %s1680_s0, 1024 }
  0x60   : > { %p1225_p1 = scmp.lt.u32.totalorder %s1541_s23, %s1680_s0  ;;  %p1226_p2 = scmp.lt.u32.totalorder %s1224_s21, %s1219_s8 }
  0x61   : > { %p1222_p12 = pnand %p1221_p9, %p1220_p7  ;;  %p1228_p8 = scmp.lt.u32.totalorder %s1219_s8, %s1541_s23 }
  0x62   : > { %p1227_p4 = por %p1226_p2, %p1225_p1 }
  0x63   : > { %p1223_p0 = pneg %p1222_p12 }
  0x64   : > { %p1229_p13 = por %p1228_p8, %p1227_p4 }
  0x66   : > { %p1230_p6 = pnand %p1229_p13, %p1223_p0 }
  0x68   : > { %1233 = shalt.err (!%p1230_p6)
}
  0x69   : > { %s1234_s20 = scalar_lea.vmem %s1547_s10, 512  ;;  %s1330_s15 = smov [#allocation2]  }
  0x6a   : > { %p1235_p10 = scmp.ne.s32.totalorder %s1547_s10, %s1234_s20  ;;  %s1239_s29 = sshll.u32 %s1330_s15, 4  ;;  %s1240_s29 = int_to_ptr.vmem [resolvable:$false] %s1239_s29 }
  0x6b   : > { %s1241_s12 = scalar_lea.vmem %s1240_s29, 1024  ;;  %p1242_p12 = scmp.lt.s32.totalorder %s1547_s10, %s1240_s29 }
  0x6c   : > { %p1237_p3 = pnand %p1235_p10, %p1221_p9  ;;  %p1243_p1 = scmp.lt.s32.totalorder %s1241_s12, %s1234_s20 }
  0x6e   : > { %p1238_p7 = pneg %p1237_p3  ;;  %p1244_p2 = por %p1243_p1, %p1242_p12 }
  0x70   : > { %p1245_p4 = pnand %p1244_p2, %p1238_p7 }
  0x72   : > { %1248 = shalt.err (!%p1245_p4)
}
  0x73   : > { %s1331_s8 = smov 256   ;;  %s1332_s17 = smov 16  }
  0x74   : > { %1047 = dma.hbm_to_vmem [thread:$0]  (!%p1543_p11), %s1541_s23, 512, %s1547_s10, %s1549_s14, %s1331_s8, %s1331_s8, %s1332_s17  }
  0x75   : > { %p1701_p9 = scmp.ne.s32.totalorder %s1695_s9, 0 }
  0x76   : > { %s1580_s21 = sand.u32 (!%p1701_p9), 1, %s1315_s25   ;;  %p1702_p0 = scmp.ne.s32.totalorder (!%p1701_p9), %s1692_s30, 0 }
  0x77   : > { %293 = sbr.rel (%p1701_p9) target bundleno = 845 (0x34d), region = 48  ;;  %s890_s16 = sshll.u32 (!%p1701_p9), %s1580_s21, 5 }
  0x78   : > { %s296_s13 = scalar_lea.sflag (!%p1701_p9), [#allocation3], %s1580_s21  ;;  %s1584_s20 = scalar_lea.vmem (!%p1701_p9), [#allocation2], %s890_s16 }
  0x7e   : > { %1294 = dma.done.wait (%p1702_p0), %s296_s13, 512  }
  0x7f   : > { %1296 = vsyncadd (%p1702_p0), %s296_s13, 4294966784  ;;  %p1703_p11 = scmp.eq.s32.totalorder %s1399_s28, 0 }
  0x81   : > { %1298 = dma.done.wait (%p1703_p11), [#allocation6], 3072   ;;  %p1704_p8 = pmov %p1703_p11 }
  0x83   : > { %1300 = vsyncadd (%p1704_p8), [#allocation6], 4294964224  ;;  %p1705_p13 = pmov %p1704_p8 }
  0x84   : > { %p1706_p6 = pmov %p1704_p8 }
  0x85   : > { %1302 = dma.done.wait (%p1705_p13), [#allocation9], 1024  }
  0x86   : > { %1304 = vsyncadd (%p1706_p6), [#allocation9], 4294966272  ;;  %v1333_v0 = vmov 0.0   ;;  %v1103_v1 = vld [vmem:[#allocation5 + $0x40] sm:$0xff]   ;;  %v1105_v3 = vld [vmem:[#allocation5 + $0x48] sm:$0xff]   ;;  %vm1334_vm0 = vmmov 0  }
  0x87   : > { %978 = vmatprep.subr.bf16.mxu1 %v1333_v0  ;;  %v1104_v2 = vld [vmem:[#allocation5] sm:$0xff]   ;;  %938 = vmatprep.subr.bf16.mxu0 %v1103_v1  ;;  %v1106_v4 = vld [vmem:[#allocation5 + $0x8] sm:$0xff]   ;;  %v1107_v5 = vld [vmem:[#allocation5 + $0x50] sm:$0xff]   ;;  %s894_s11 = sshll.u32 %s1580_s21, 4  ;;  %s937_s8 = sshll.u32 %s1399_s28, 8 }
  0x88   : > { %939 = vmatpush3.bf16.msra.mxu0 %v1104_v2  ;;  %v1108_v6 = vld [vmem:[#allocation5 + $0x10] sm:$0xff]   ;;  %v1109_v7 = vld [vmem:[#allocation5 + $0x58] sm:$0xff]   ;;  %v1111_v9 = vld [vmem:[#allocation5 + $0x60] sm:$0xff]   ;;  %994 = vmatprep.mubr.msk.bf16.mxu1 %vm1334_vm0, %v1333_v0  ;;  %s341_s29 = scalar_lea.vmem [#allocation10], %s894_s11  ;;  %s1636_s13 = scalar_lea.hbm %s1687_s7, %s937_s8 }
  0x89   : > { %940 = vmatprep.subr.bf16.mxu0 %v1105_v3  ;;  %v1110_v8 = vld [vmem:[#allocation5 + $0x18] sm:$0xff]   ;;  %v1112_v10 = vld [vmem:[#allocation5 + $0x20] sm:$0xff]   ;;  %v1113_v11 = vld [vmem:[#allocation5 + $0x68] sm:$0xff]   ;;  %s777_s12 = sshll.u32 %s341_s29, 4  ;;  %s1335_s30 = smov [#allocation10]   ;;  %s1631_s12 = int_to_ptr.vmem [resolvable:$true] %s777_s12 }
  0x8a   : > { %v346_v12 = vld [vmem:[%s1584_s20 + $0x8] sm:$0xff]  ;;  %v348_v13 = vld [vmem:[%s1584_s20 + $0x18] sm:$0xff]  ;;  %v1119_v16 = vld [vmem:[#allocation7] sm:$0xff]   ;;  %s1249_s28 = scalar_lea.vmem %s1631_s12, 256  ;;  %s1253_s9 = sshll.u32 %s1335_s30, 4  ;;  %s1254_s9 = int_to_ptr.vmem [resolvable:$false] %s1253_s9 }
  0x8b   : > { %v1114_v14 = vld [vmem:[#allocation5 + $0x28] sm:$0xff]   ;;  %v350_v15 = vpack.c.bf16 %v348_v13, %v346_v12  ;;  %v1115_v17 = vld [vmem:[#allocation5 + $0x70] sm:$0xff]   ;;  %979 = vmatpush3.bf16.msra.mxu1 %v1119_v16  ;;  %v1117_v20 = vld [vmem:[#allocation5 + $0x78] sm:$0xff]   ;;  %p1250_p10 = scmp.ne.s32.totalorder %s1631_s12, %s1249_s28  ;;  %s1255_s23 = scalar_lea.vmem %s1254_s9, 512 }
  0x8c   : > { %941 = vmatpush3.bf16.msra.mxu0 %v1106_v4  ;;  %v1120_v18 = vld [vmem:[#allocation7 + $0x8] sm:$0xff]   ;;  %v1116_v19 = vld [vmem:[#allocation5 + $0x30] sm:$0xff]   ;;  %980 = vmatprep.subr.bf16.mxu1 %v1333_v0  ;;  %v1118_v22 = vld [vmem:[#allocation5 + $0x38] sm:$0xff]   ;;  %p1256_p12 = scmp.lt.s32.totalorder %s1631_s12, %s1254_s9  ;;  %p1257_p1 = scmp.lt.s32.totalorder %s1255_s23, %s1249_s28 }
  0x8d   : > { %942 = vmatprep.subr.bf16.mxu0 %v1107_v5  ;;  %518 = vmatprep.mubr.bf16.mxu0 %v350_v15  ;;  %v1121_v21 = vld [vmem:[#allocation7 + $0x10] sm:$0xff]   ;;  %v345_v23 = vld [vmem:[%s1584_s20] sm:$0xff]  ;;  %v1122_v25 = vld [vmem:[#allocation7 + $0x18] sm:$0xff]   ;;  %p1251_p3 = pnand %p1250_p10, %p1532_p5 }
  0x8e   : > { %v347_v24 = vld [vmem:[%s1584_s20 + $0x10] sm:$0xff]  ;;  %v1123_v27 = vld [vmem:[#allocation7 + $0x20] sm:$0xff]   ;;  %v1124_v28 = vld [vmem:[#allocation7 + $0x28] sm:$0xff]   ;;  %s764_s20 = scalar_lea.sflag [#allocation4], %s1580_s21  ;;  %p1258_p2 = por %p1257_p1, %p1256_p12 }
  0x8f   : > { %981 = vmatpush3.bf16.msra.mxu1 %v1120_v18  ;;  %v349_v26 = vpack.c.bf16 %v347_v24, %v345_v23  ;;  %v1125_v29 = vld [vmem:[#allocation7 + $0x30] sm:$0xff]   ;;  %v1126_v30 = vld [vmem:[#allocation7 + $0x38] sm:$0xff]   ;;  %v1127_v31 = vld [vmem:[#allocation8] sm:$0xff]   ;;  %p1252_p7 = pneg %p1251_p3 }
  0x90   : > { %943 = vmatpush3.bf16.msra.mxu0 %v1108_v6  ;;  %982 = vmatprep.subr.bf16.mxu1 %v1333_v0  ;;  %v1128_v32 = vld [vmem:[#allocation8 + $0x8] sm:$0xff]   ;;  %v1129_v33 = vld [vmem:[#allocation8 + $0x10] sm:$0xff]   ;;  %v1130_v34 = vld [vmem:[#allocation8 + $0x18] sm:$0xff]  }
  0x91   : > { %944 = vmatprep.subr.bf16.mxu0 %v1109_v7  ;;  %v1131_v35 = vld [vmem:[#allocation8 + $0x20] sm:$0xff]   ;;  %v1132_v50 = vld [vmem:[#allocation8 + $0x28] sm:$0xff]   ;;  %v1133_v51 = vld [vmem:[#allocation8 + $0x30] sm:$0xff]   ;;  %p1259_p4 = pnand %p1258_p2, %p1252_p7 }
  0x92   : > { %v895_v37 = vld [vmem:[%s1682_s2] ss:$0 sm:$0xff]  ;;  %v1134_v52 = vld [vmem:[#allocation8 + $0x38] sm:$0xff]  }
  0x93   : > { %983 = vmatpush3.bf16.msra.mxu1 %v1121_v21  ;;  %v912_v53 = vld [vmem:[%s1684_s4] ss:$0 sm:$0xff] }
  0x94   : > { %945 = vmatpush3.bf16.msra.mxu0 %v1110_v8  ;;  %984 = vmatprep.subr.bf16.mxu1 %v1333_v0 }
  0x95   : > { %946 = vmatprep.subr.bf16.mxu0 %v1111_v9 }
  0x97   : > { %985 = vmatpush3.bf16.msra.mxu1 %v1122_v25 }
  0x98   : > { %947 = vmatpush3.bf16.msra.mxu0 %v1112_v10  ;;  %986 = vmatprep.subr.bf16.mxu1 %v1333_v0 }
  0x99   : > { %948 = vmatprep.subr.bf16.mxu0 %v1113_v11 }
  0x9b   : > { %987 = vmatpush3.bf16.msra.mxu1 %v1123_v27 }
  0x9c   : > { %949 = vmatpush3.bf16.msra.mxu0 %v1114_v14  ;;  %988 = vmatprep.subr.bf16.mxu1 %v1333_v0 }
  0x9d   : > { %950 = vmatprep.subr.bf16.mxu0 %v1115_v17 }
  0x9f   : > { %989 = vmatpush3.bf16.msra.mxu1 %v1124_v28 }
  0xa0   : > { %951 = vmatpush3.bf16.msra.mxu0 %v1116_v19  ;;  %990 = vmatprep.subr.bf16.mxu1 %v1333_v0 }
  0xa1   : > { %952 = vmatprep.subr.bf16.mxu0 %v1117_v20 }
  0xa3   : > { %991 = vmatpush3.bf16.msra.mxu1 %v1125_v29 }
  0xa4   : > { %953 = vmatpush3.bf16.msra.mxu0 %v1118_v22  ;;  %992 = vmatprep.subr.bf16.mxu1 %v1333_v0 }
  0xa5   : > { %998 = vmatprep.subr.bf16.mxu0 %v1333_v0 }
  0xa7   : > { %519 = vmatmul.mubr.bf16.vlgmr.msra.gmra.mrb[0].mxu0 %v349_v26  ;;  %993 = vmatpush3.bf16.msra.mxu1 %v1126_v30 }
  0xa8   : > { %1014 = vmatprep.mubr.msk.bf16.mxu0 %vm1334_vm0, %v1333_v0  ;;  %999 = vmatpush3.bf16.msra.mxu0 %v1127_v31 }
  0xa9   : > { %1000 = vmatprep.subr.bf16.mxu0 %v1333_v0 }
  0xac   : > { %1001 = vmatpush3.bf16.msra.mxu0 %v1128_v32 }
  0xad   : > { %1002 = vmatprep.subr.bf16.mxu0 %v1333_v0 }
  0xb0   : > { %1003 = vmatpush3.bf16.msra.mxu0 %v1129_v33 }
  0xb1   : > { %1004 = vmatprep.subr.bf16.mxu0 %v1333_v0 }
  0xb4   : > { %1005 = vmatpush3.bf16.msra.mxu0 %v1130_v34 }
  0xb5   : > { %1006 = vmatprep.subr.bf16.mxu0 %v1333_v0 }
  0xb8   : > { %1007 = vmatpush3.bf16.msra.mxu0 %v1131_v35 }
  0xb9   : > { %1008 = vmatprep.subr.bf16.mxu0 %v1333_v0 }
  0xbc   : > { %1009 = vmatpush3.bf16.msra.mxu0 %v1132_v50 }
  0xbd   : > { %1010 = vmatprep.subr.bf16.mxu0 %v1333_v0 }
  0xc0   : > { %1011 = vmatpush3.bf16.msra.mxu0 %v1133_v51 }
  0xc1   : > { %1012 = vmatprep.subr.bf16.mxu0 %v1333_v0  ;;  %v921_v0 = vld [vmem:[%s1686_s6] ss:$0 sm:$0xff] }
  0xc4   : > { %1013 = vmatpush3.bf16.msra.mxu0 %v1134_v52 }
 0x17a   : > { %v954_v36 = vpop.f32.mrb[0].mxu0 }
 0x17b   : > { %v955_v38 = vpop.f32.mrb[1].mxu0 }
 0x17c   : > { %v956_v39 = vadd.f32 %v955_v38, %v954_v36  ;;  %v957_v40 = vpop.f32.mrb[2].mxu0 }
 0x17d   : > { %v958_v41 = vpop.f32.mrb[3].mxu0 }
 0x17e   : > { %v521_v42 = vadd.f32 %v956_v39, %v895_v37  ;;  %v959_v43 = vadd.f32 %v958_v41, %v957_v40 }
 0x180   : > { %v527_v44 = vmul.f32 0.01, %v521_v42  ;;  %v524_v45 = vadd.f32 %v959_v43, %v895_v37 }
 0x182   : > { %v528_v46 = vmul.f32 0.01, %v524_v45  ;;  %v529_v47 = vmax.f32 %v521_v42, %v527_v44 }
 0x184   : > { %v530_v48 = vmax.f32 %v524_v45, %v528_v46 }
 0x186   : > { %v531_v49 = vpack.c.bf16 %v530_v48, %v529_v47 }
 0x188   : > { %995 = vmatmul.mubr.bf16.vlgmr.msra.gmra.mrb[0].mxu1 %v531_v49 }
 0x25b   : > { %v637_v54 = vpop.f32.mrb[0].mxu1 }
 0x25c   : > { %v638_v55 = vadd.f32 %v912_v53, %v637_v54  ;;  %v996_v56 = vpop.f32.mrb[1].mxu1 }
 0x25d   : > { %v640_v57 = vpop.f32.mrb[2].mxu1 }
 0x25e   : > { %v644_v58 = vmul.f32 0.01, %v638_v55  ;;  %v641_v59 = vadd.f32 %v912_v53, %v640_v57  ;;  %v997_v60 = vpop.f32.mrb[3].mxu1 }
 0x260   : > { %v645_v61 = vmul.f32 0.01, %v641_v59  ;;  %v646_v62 = vmax.f32 %v638_v55, %v644_v58 }
 0x262   : > { %v647_v63 = vmax.f32 %v641_v59, %v645_v61 }
 0x264   : > { %v648_v1 = vpack.c.bf16 %v647_v63, %v646_v62 }
 0x266   : > { %1015 = vmatmul.mubr.bf16.vlgmr.msra.gmra.mrb[4].mxu0 %v648_v1 }
 0x339   : > { %v754_v2 = vpop.f32.mrb[4].mxu0 }
 0x33a   : > { %v755_v3 = vadd.f32 %v921_v0, %v754_v2  ;;  %v1016_v4 = vpop.f32.mrb[5].mxu0 }
 0x33b   : > { %v757_v5 = vpop.f32.mrb[6].mxu0 }
 0x33c   : > { %761 = vst [vmem:[%s341_s29] sm:$0xff] %v755_v3  ;;  %v758_v6 = vadd.f32 %v921_v0, %v757_v5  ;;  %v1017_v7 = vpop.f32.mrb[7].mxu0 }
 0x33e   : > { %762 = vst [vmem:[%s341_s29 + $0x8] sm:$0xff] %v758_v6 }
 0x33f   : > { %1262 = shalt.err (!%p1259_p4)
}
 0x340   : > { %s1263_s10 = scalar_lea.hbm %s1636_s13, 256  ;;  %s1267_s15 = scalar_lea.hbm %s1687_s7, 512 }
 0x341   : > { %p1264_p9 = scmp.ne.s32.totalorder %s1636_s13, %s1263_s10  ;;  %p1268_p8 = scmp.lt.u32.totalorder %s1636_s13, %s1687_s7 }
 0x342   : > { %p1269_p13 = scmp.lt.u32.totalorder %s1267_s15, %s1263_s10  ;;  %p1271_p10 = scmp.lt.u32.totalorder %s1263_s10, %s1636_s13 }
 0x343   : > { %p1265_p0 = pnand %p1264_p9, %p1532_p5 }
 0x344   : > { %p1270_p6 = por %p1269_p13, %p1268_p8 }
 0x345   : > { %p1266_p11 = pneg %p1265_p0 }
 0x346   : > { %p1272_p3 = por %p1271_p10, %p1270_p6 }
 0x348   : > { %p1273_p7 = pnand %p1272_p3, %p1266_p11 }
 0x34a   : > { %1276 = shalt.err (!%p1273_p7)
}
 0x34b   : > { %s1336_s17 = smov 128   ;;  %s1337_s16 = smov 8  }
 0x34c   : > { %1032 = dma.vmem_to_hbm [thread:$0]  (%p1532_p5), %s1631_s12, 256, %s1636_s13, %s764_s20, %s1336_s17, %s1336_s17, %s1337_s16  }
 0x34d PF: > { %s1707_s28 = sld [smem:[#allocation15_spill]]  ;;  %s792_s30 = sand.u32 1, %s1311_s24  }
 0x34e   : > { %p1709_p1 = scmp.ge.s32.totalorder %s1323_s27, 2  ;;  %s793_s9 = scalar_lea.sflag [#allocation4], %s792_s30 }
 0x353   : > { %p1708_p12 = scmp.ne.s32.totalorder %s1707_s28, 0 }
 0x355   : > { %p1049_p2 = pnand %p1709_p1, %p1708_p12 }
 0x357   : > { %1306 = dma.done.wait (!%p1049_p2), %s793_s9, 256  }
 0x358   : > { %1308 = vsyncadd (!%p1049_p2), %s793_s9, 4294967040  ;;  %p22_p4 = scmp.ge.s32.totalorder %s1518_s22, 4   ;;  %s1710_s24 = smov %s1315_s25 }
 0x359   : > { %s1711_s25 = smov %s1319_s26  ;;  %s1712_s26 = smov %s1528_s18 }
 0x35a   : > { %s1713_s27 = smov %s1518_s22  ;;  %24 = sbr.rel (!%p22_p4) target bundleno = 7 (0x7), region = 105 }
 0x361   :  { %798 = vsyncpa [#allocation3], 1 }
 0x362   :  { %800 = vsyncpa [#allocation3 + $0x1], 1 }
 0x363   :  { %801 = vsyncpa [#allocation6], 1 }
 0x364   :  { %802 = vsyncpa [#allocation9], 1 }
 0x365   :  { %803 = vsyncpa [#allocation4], 1 }
 0x366   :  { %805 = vsyncpa [#allocation4 + $0x1], 1 }

</bundles_post_ra>
